<compile_context>
chip_gen: v5e
topology: v5e:2x2
jax: 0.10.0
libtpu: 0.0.40
codegen_flags: <defaults>
</compile_context>

<pallas_src>
import functools

import jax
import jax.numpy as jnp
from jax.experimental import pallas as pl
from jax.experimental.pallas import tpu as pltpu

HIDDEN = 100          # PyTorch hidden size
HP = 128              # padded hidden size (lane aligned)
OUT_W = 128           # lane-dense packed output width: [alpha | beta | v | zeros]
GRIDLESS_MAX_B = 1024  # above this, auto-route to the tiled (multi-step) path


def _controller_kernel(num_ab,
                       lat_ref, rec_ref,
                       w1l_ref, w1r_ref, b1_ref,
                       w2_ref, b2_ref,
                       out_ref):
    # Weights may be bf16: cast activations to match so the MXU runs natively
    # in the weight dtype; accumulate in f32 (preferred_element_type).
    wdt = w1l_ref.dtype

    # ---- stage 1: fused (fc | value) trunk:  ReLU(x @ W1 + b1), x split in rows ----
    h = (jnp.dot(lat_ref[...].astype(wdt), w1l_ref[...],
                 preferred_element_type=jnp.float32)
         + jnp.dot(rec_ref[...].astype(wdt), w1r_ref[...],
                   preferred_element_type=jnp.float32)
         + b1_ref[...])
    h = jnp.maximum(h, 0.0)                                   # [TB, 2*HP] f32

    # ---- stage 2: fused (alpha | beta | v) heads in one matmul ----
    lin = jnp.dot(h.astype(wdt), w2_ref[...],
                  preferred_element_type=jnp.float32) + b2_ref[...]

    # Softplus(+1) only on the alpha/beta columns; v and padding pass through.
    # Matches torch.nn.Softplus(beta=1, threshold=20): linear above threshold.
    sp = jnp.where(lin > 20.0, lin, jnp.log1p(jnp.exp(jnp.minimum(lin, 20.0))))
    col = jax.lax.broadcasted_iota(jnp.int32, lin.shape, 1)
    out_ref[...] = jnp.where(col < num_ab, sp + 1.0, lin).astype(out_ref.dtype)


def fuse_params(params, latents, recurrents, actions,
                hidden=HIDDEN, hp=HP, out_w=OUT_W, weight_dtype=jnp.float32):
    """One-time param prep: pad hidden to 128, fuse shared-operand weights/biases.

    weight_dtype=jnp.bfloat16 halves the weight-DMA bytes (the dominant
    critical-path cost at small B); biases stay f32 (added post-accumulation).
    """
    d = latents + recurrents
    a = actions

    # Stage-1 weight [D, 2*HP]: cols [0:HP) = policy trunk (wfc), [HP:2HP) = value (wv1).
    w1 = jnp.zeros((d, 2 * hp), jnp.float32)
    w1 = w1.at[:, :hidden].set(params["wfc"])
    w1 = w1.at[:, hp:hp + hidden].set(params["wv1"])
    b1 = jnp.zeros((1, 2 * hp), jnp.float32)
    b1 = b1.at[:, :hidden].set(params["bfc"])
    b1 = b1.at[:, hp:hp + hidden].set(params["bv1"])

    # Stage-2 weight [2*HP, OUT_W]: cols [0:A)=alpha, [A:2A)=beta, [2A]=v, rest 0.
    w2 = jnp.zeros((2 * hp, out_w), jnp.float32)
    w2 = w2.at[:hidden, 0:a].set(params["wa"])
    w2 = w2.at[:hidden, a:2 * a].set(params["wb"])
    w2 = w2.at[hp:hp + hidden, 2 * a:2 * a + 1].set(params["wv2"])
    b2 = jnp.zeros((1, out_w), jnp.float32)
    b2 = b2.at[:, 0:a].set(params["ba"])
    b2 = b2.at[:, a:2 * a].set(params["bb"])
    b2 = b2.at[:, 2 * a:2 * a + 1].set(params["bv2"])

    wdt = weight_dtype
    return dict(w1_lat=w1[:latents].astype(wdt),
                w1_rec=w1[latents:].astype(wdt),
                b1=b1,
                w2=w2.astype(wdt),
                b2=b2)


def _auto_tile(B):
    """Largest tile in {2048,...,8} that divides B with >= 2 grid steps."""
    for t in (2048, 1024, 512, 256, 128, 64, 32, 16, 8):
        if t < B and B % t == 0:
            return t
    return None


def controller_forward(latent, recurrent, fused, actions, *,
                       tile_b=None, out_dtype=jnp.float32, return_packed=False):
    """latent: [B, L], recurrent: [B, R] -> ((alpha, beta), v).

    If return_packed=True, returns the lane-dense [B, OUT_W] slab
    ([alpha | beta | v | zeros]) so large-B consumers avoid the slice launches.
    """
    B, L = latent.shape
    R = recurrent.shape[1]
    H2 = fused["w1_lat"].shape[1]           # 2*HP
    OUT = fused["w2"].shape[1]              # OUT_W
    A = actions

    w_bytes = sum(int(fused[k].size) * jnp.dtype(fused[k].dtype).itemsize
                  for k in ("w1_lat", "w1_rec", "b1", "w2", "b2"))
    cost = pl.CostEstimate(
        flops=2 * B * ((L + R) * H2 + H2 * OUT),
        transcendentals=2 * B * OUT,
        bytes_accessed=(B * (L + R) * latent.dtype.itemsize
                        + w_bytes
                        + B * OUT * jnp.dtype(out_dtype).itemsize))

    kernel = functools.partial(_controller_kernel, 2 * A)
    out_shape = jax.ShapeDtypeStruct((B, OUT), out_dtype)
    args = (latent, recurrent,
            fused["w1_lat"], fused["w1_rec"], fused["b1"],
            fused["w2"], fused["b2"])

    # Auto-route big batches to the tiled path (>= 2 grid steps -> both v7x TCs
    # get work; grid-less VMEM footprint stays bounded).
    if tile_b is None and B > GRIDLESS_MAX_B:
        tile_b = _auto_tile(B)

    if tile_b is None or tile_b >= B:
        # Grid-less single shot: whole problem lives in VMEM, no step overhead.
        # VMEM limit sized from B, capped at 64 MiB (v7x physical VMEM).
        vmem_needed = B * (L + R + H2 + OUT) * 4 + w_bytes + (2 << 20)
        vmem_limit = int(min(max(vmem_needed, 32 << 20), 64 << 20))
        out = pl.pallas_call(
            kernel,
            out_shape=out_shape,
            cost_estimate=cost,
            compiler_params=pltpu.CompilerParams(vmem_limit_bytes=vmem_limit),
        )(*args)
    else:
        # Large-B path: big batch tiles (~512-2048 rows) so the ~0.35 us per-step
        # overhead is amortized over real work; weights stay VMEM-resident
        # (constant index_map); parallel grid lets v7x shard across both TCs.
        assert B % tile_b == 0 and tile_b % 8 == 0
        out = pl.pallas_call(
            kernel,
            out_shape=out_shape,
            grid=(B // tile_b,),
            in_specs=[
                pl.BlockSpec((tile_b, L), lambda i: (i, 0)),
                pl.BlockSpec((tile_b, R), lambda i: (i, 0)),
                pl.BlockSpec((L, H2), lambda i: (0, 0)),
                pl.BlockSpec((R, H2), lambda i: (0, 0)),
                pl.BlockSpec((1, H2), lambda i: (0, 0)),
                pl.BlockSpec((H2, OUT), lambda i: (0, 0)),
                pl.BlockSpec((1, OUT), lambda i: (0, 0)),
            ],
            out_specs=pl.BlockSpec((tile_b, OUT), lambda i: (i, 0)),
            compiler_params=pltpu.CompilerParams(
                dimension_semantics=("parallel",)),
            cost_estimate=cost,
        )(*args)

    if return_packed:
        return out
    alpha = out[:, :A]
    beta = out[:, A:2 * A]
    v = out[:, 2 * A:2 * A + 1]
    return (alpha, beta), v


def init_params(key, latents, recurrents, actions, hidden=HIDDEN):
    """Deterministic init (uniform, PyTorch-Linear-like fan-in scaling).
    Weights stored transposed vs PyTorch: [in_features, out_features]."""
    d = latents + recurrents
    keys = jax.random.split(key, 10)

    def lin(kw, kb, fan_in, fan_out):
        bound = 1.0 / jnp.sqrt(fan_in)
        w = jax.random.uniform(kw, (fan_in, fan_out), jnp.float32, -bound, bound)
        b = jax.random.uniform(kb, (1, fan_out), jnp.float32, -bound, bound)
        return w, b

    wv1, bv1 = lin(keys[0], keys[1], d, hidden)
    wv2, bv2 = lin(keys[2], keys[3], hidden, 1)
    wfc, bfc = lin(keys[4], keys[5], d, hidden)
    wa, ba = lin(keys[6], keys[7], hidden, actions)
    wb, bb = lin(keys[8], keys[9], hidden, actions)
    return dict(wv1=wv1, bv1=bv1, wv2=wv2, bv2=bv2,
                wfc=wfc, bfc=bfc, wa=wa, ba=ba, wb=wb, bb=bb)


if __name__ == "__main__":
    LATENTS, RECURRENTS, ACTIONS = 32, 32, 4

    key = jax.random.PRNGKey(0)
    k_lat, k_rec, k_par, k_big = jax.random.split(key, 4)
    params = init_params(k_par, LATENTS, RECURRENTS, ACTIONS)

    def ref_forward(latent, recurrent):
        cat = jnp.concatenate([latent, recurrent], axis=1)
        h_v = jnp.maximum(cat @ params["wv1"] + params["bv1"], 0.0)
        v_ref = h_v @ params["wv2"] + params["bv2"]
        h = jnp.maximum(cat @ params["wfc"] + params["bfc"], 0.0)
        sp = lambda t: jnp.where(t > 20.0, t, jnp.log1p(jnp.exp(jnp.minimum(t, 20.0))))
        alpha_ref = sp(h @ params["wa"] + params["ba"]) + 1.0
        beta_ref = sp(h @ params["wb"] + params["bb"]) + 1.0
        return alpha_ref, beta_ref, v_ref

    # ---- small-B (B=16): grid-less single shot, fp32 weights ----------------
    B = 16
    latent = jax.random.normal(k_lat, (B, LATENTS), jnp.float32)
    recurrent = jax.random.normal(k_rec, (B, RECURRENTS), jnp.float32)
    fused_f32 = fuse_params(params, LATENTS, RECURRENTS, ACTIONS)

    (alpha, beta), v = controller_forward(latent, recurrent, fused_f32, ACTIONS)
    jax.block_until_ready((alpha, beta, v))

    a_ref, b_ref, v_ref = ref_forward(latent, recurrent)
    assert alpha.shape == (B, ACTIONS) and beta.shape == (B, ACTIONS) and v.shape == (B, 1)
    assert jnp.allclose(alpha, a_ref, atol=1e-5, rtol=1e-5)
    assert jnp.allclose(beta, b_ref, atol=1e-5, rtol=1e-5)
    assert jnp.allclose(v, v_ref, atol=1e-5, rtol=1e-5)

    # ---- small-B, bf16 weights (halves critical-path weight DMA) ------------
    fused_bf16 = fuse_params(params, LATENTS, RECURRENTS, ACTIONS,
                             weight_dtype=jnp.bfloat16)
    (alpha_b, beta_b), v_b = controller_forward(latent, recurrent, fused_bf16, ACTIONS)
    jax.block_until_ready((alpha_b, beta_b, v_b))
    assert jnp.allclose(alpha_b, a_ref, atol=5e-2, rtol=5e-2)
    assert jnp.allclose(beta_b, b_ref, atol=5e-2, rtol=5e-2)
    assert jnp.allclose(v_b, v_ref, atol=5e-2, rtol=5e-2)

    # ---- large-B: auto-tiled path (2 grid steps of 2048 rows), fp32 ---------
    BIG = 4096
    k_bl, k_br = jax.random.split(k_big)
    lat_big = jax.random.normal(k_bl, (BIG, LATENTS), jnp.float32)
    rec_big = jax.random.normal(k_br, (BIG, RECURRENTS), jnp.float32)

    (alpha_t, beta_t), v_t = controller_forward(lat_big, rec_big, fused_f32, ACTIONS)
    jax.block_until_ready((alpha_t, beta_t, v_t))
    a_rt, b_rt, v_rt = ref_forward(lat_big, rec_big)
    assert jnp.allclose(alpha_t, a_rt, atol=1e-5, rtol=1e-5)
    assert jnp.allclose(beta_t, b_rt, atol=1e-5, rtol=1e-5)
    assert jnp.allclose(v_t, v_rt, atol=1e-5, rtol=1e-5)

    # ---- large-B, bf16 weights + packed bf16 output slab (min HBM bytes) ----
    out_packed = controller_forward(lat_big, rec_big, fused_bf16, ACTIONS,
                                    out_dtype=jnp.bfloat16, return_packed=True)
    jax.block_until_ready(out_packed)
    assert out_packed.shape == (BIG, OUT_W) and out_packed.dtype == jnp.bfloat16
    assert jnp.allclose(out_packed[:, :ACTIONS].astype(jnp.float32), a_rt,
                        atol=1e-1, rtol=5e-2)

    print("KERNEL_OK")
</pallas_src>

<mosaic_0001>
module attributes {stable_mosaic.version = 11 : i64} {
  func.func @_controller_kernel(%arg0: memref<16x32xf32, #tpu.memory_space<vmem>>, %arg1: memref<16x32xf32, #tpu.memory_space<vmem>>, %arg2: memref<32x256xf32, #tpu.memory_space<vmem>>, %arg3: memref<32x256xf32, #tpu.memory_space<vmem>>, %arg4: memref<1x256xf32, #tpu.memory_space<vmem>>, %arg5: memref<256x128xf32, #tpu.memory_space<vmem>>, %arg6: memref<1x128xf32, #tpu.memory_space<vmem>>, %arg7: memref<16x128xf32, #tpu.memory_space<vmem>>) attributes {dimension_semantics = [], scalar_prefetch = 0 : i64, scratch_operands = 0 : i64, tpu.core_type = #tpu.core_type<tc>} {
    %c0 = arith.constant 0 : index
    %c0_0 = arith.constant 0 : index
    %0 = vector.load %arg0[%c0, %c0_0] : memref<16x32xf32, #tpu.memory_space<vmem>>, vector<16x32xf32>
    %c0_1 = arith.constant 0 : index
    %c0_2 = arith.constant 0 : index
    %1 = vector.load %arg2[%c0_1, %c0_2] : memref<32x256xf32, #tpu.memory_space<vmem>>, vector<32x256xf32>
    %cst = arith.constant dense<0.000000e+00> : vector<16x256xf32>
    %2 = tpu.matmul %0, %1, %cst {dimension_numbers = #tpu.dot_dimension_numbers<[1], [0], [0], [1], [0, 0, 1, 1], [], []>} : vector<16x32xf32>, vector<32x256xf32>, vector<16x256xf32> -> vector<16x256xf32>
    %c0_3 = arith.constant 0 : index
    %c0_4 = arith.constant 0 : index
    %3 = vector.load %arg1[%c0_3, %c0_4] : memref<16x32xf32, #tpu.memory_space<vmem>>, vector<16x32xf32>
    %c0_5 = arith.constant 0 : index
    %c0_6 = arith.constant 0 : index
    %4 = vector.load %arg3[%c0_5, %c0_6] : memref<32x256xf32, #tpu.memory_space<vmem>>, vector<32x256xf32>
    %cst_7 = arith.constant dense<0.000000e+00> : vector<16x256xf32>
    %5 = tpu.matmul %3, %4, %cst_7 {dimension_numbers = #tpu.dot_dimension_numbers<[1], [0], [0], [1], [0, 0, 1, 1], [], []>} : vector<16x32xf32>, vector<32x256xf32>, vector<16x256xf32> -> vector<16x256xf32>
    %6 = arith.addf %2, %5 : vector<16x256xf32>
    %c0_8 = arith.constant 0 : index
    %c0_9 = arith.constant 0 : index
    %7 = vector.load %arg4[%c0_8, %c0_9] : memref<1x256xf32, #tpu.memory_space<vmem>>, vector<1x256xf32>
    %8 = vector.broadcast %7 : vector<1x256xf32> to vector<16x256xf32>
    %9 = arith.addf %6, %8 : vector<16x256xf32>
    %cst_10 = arith.constant 0.000000e+00 : f32
    %10 = vector.broadcast %cst_10 : f32 to vector<16x256xf32>
    %11 = arith.maximumf %9, %10 : vector<16x256xf32>
    %c0_11 = arith.constant 0 : index
    %c0_12 = arith.constant 0 : index
    %12 = vector.load %arg5[%c0_11, %c0_12] : memref<256x128xf32, #tpu.memory_space<vmem>>, vector<256x128xf32>
    %cst_13 = arith.constant dense<0.000000e+00> : vector<16x128xf32>
    %13 = tpu.matmul %11, %12, %cst_13 {dimension_numbers = #tpu.dot_dimension_numbers<[1], [0], [0], [1], [0, 0, 1, 1], [], []>} : vector<16x256xf32>, vector<256x128xf32>, vector<16x128xf32> -> vector<16x128xf32>
    %c0_14 = arith.constant 0 : index
    %c0_15 = arith.constant 0 : index
    %14 = vector.load %arg6[%c0_14, %c0_15] : memref<1x128xf32, #tpu.memory_space<vmem>>, vector<1x128xf32>
    %15 = vector.broadcast %14 : vector<1x128xf32> to vector<16x128xf32>
    %16 = arith.addf %13, %15 : vector<16x128xf32>
    %cst_16 = arith.constant 2.000000e+01 : f32
    %17 = vector.broadcast %cst_16 : f32 to vector<16x128xf32>
    %18 = arith.cmpf ogt, %16, %17 : vector<16x128xf32>
    %cst_17 = arith.constant 2.000000e+01 : f32
    %19 = vector.broadcast %cst_17 : f32 to vector<16x128xf32>
    %20 = arith.minimumf %16, %19 : vector<16x128xf32>
    %21 = math.exp %20 : vector<16x128xf32>
    %22 = math.log1p %21 : vector<16x128xf32>
    %23 = arith.select %18, %16, %22 : vector<16x128xi1>, vector<16x128xf32>
    %24 = tpu.iota {dimensions = array<i32: 1>} : vector<16x128xi32>
    %c8_i32 = arith.constant 8 : i32
    %25 = vector.broadcast %c8_i32 : i32 to vector<16x128xi32>
    %26 = arith.cmpi slt, %24, %25 : vector<16x128xi32>
    %cst_18 = arith.constant 1.000000e+00 : f32
    %27 = vector.broadcast %cst_18 : f32 to vector<16x128xf32>
    %28 = arith.addf %23, %27 : vector<16x128xf32>
    %29 = arith.select %26, %28, %16 : vector<16x128xi1>, vector<16x128xf32>
    %c0_19 = arith.constant 0 : index
    %c0_20 = arith.constant 0 : index
    %30 = vector.load %arg7[%c0_19, %c0_20] : memref<16x128xf32, #tpu.memory_space<vmem>>, vector<16x128xf32>
    tpu.vector_store %arg7[%c0_19, %c0_20], %29 {strides = array<i32>} : memref<16x128xf32, #tpu.memory_space<vmem>>, vector<16x128xf32>,
    return
  }
}

</mosaic_0001>

<bundles_post_ra>
// kernel: tpu_custom_call.1
= control target key start
LH: loop header
LB: loop body
LE: loop exit
PB: predicated region body
PF: predicated region fallthrough
CT: control target
= control target key end

     0   :  { %12 = vsyncpa [#allocation3], 0  ;;  %s659_s0 = inlined_call_operand.hbm [shape: f32[16,32], index: 0, kind: input, shape index: {}]   ;;  %s660_s1 = inlined_call_operand.hbm [shape: f32[16,32], index: 1, kind: input, shape index: {}]   ;;  %s661_s2 = inlined_call_operand.hbm [shape: f32[32,256], index: 2, kind: input, shape index: {}]   ;;  %s662_s3 = inlined_call_operand.hbm [shape: f32[32,256], index: 3, kind: input, shape index: {}]   ;;  %s663_s4 = inlined_call_operand.vmem [shape: f32[1,256], index: 4, kind: input, shape index: {}]   ;;  %s664_s5 = inlined_call_operand.hbm [shape: f32[256,128], index: 5, kind: input, shape index: {}]   ;;  %s665_s6 = inlined_call_operand.vmem [shape: f32[1,128], index: 6, kind: input, shape index: {}]   ;;  %s666_s7 = inlined_call_operand.hbm [shape: f32[16,128], index: 7, kind: output, shape index: {}]  }
   0x1   :  { %13 = vsyncpa [#allocation6], 0 }
   0x2   :  { %14 = vsyncpa [#allocation9], 0 }
   0x3   :  { %15 = vsyncpa [#allocation4], 0  ;;  %s33_s26 = sshll.u32 %s660_s1, 4  ;;  %s563_s27 = smov [#allocation5]   ;;  %s34_s26 = int_to_ptr.hbm [resolvable:$true] %s33_s26 }
   0x4   :  { %s35_s28 = sshll.u32 %s563_s27, 4  ;;  %s564_s29 = smov 128   ;;  %s36_s28 = int_to_ptr.vmem [resolvable:$true] %s35_s28 }
   0x5   :  { %s565_s30 = smov 8   ;;  %s59_s10 = sshll.u32 %s662_s3, 4  ;;  %s60_s10 = int_to_ptr.hbm [resolvable:$true] %s59_s10 }
   0x6   :  { %41 = dma.hbm_to_vmem [thread:$0]  %s34_s26, 256, %s36_s28, [#allocation6], %s564_s29, %s564_s29, %s565_s30  }
   0x7   :  { %s566_s11 = smov [#allocation8]   ;;  %s20_s1 = sshll.u32 %s659_s0, 4  ;;  %s21_s1 = int_to_ptr.hbm [resolvable:$true] %s20_s1 }
   0x8   :  { %s61_s12 = sshll.u32 %s566_s11, 4  ;;  %s567_s15 = smov 256   ;;  %s62_s12 = int_to_ptr.vmem [resolvable:$true] %s61_s12 }
   0x9   :  { %s568_s16 = smov 16   ;;  %s46_s19 = sshll.u32 %s661_s2, 4  ;;  %s47_s19 = int_to_ptr.hbm [resolvable:$true] %s46_s19 }
   0xa   :  { %67 = dma.hbm_to_vmem [thread:$0]  %s60_s10, 1024, %s62_s12, [#allocation9], %s567_s15, %s567_s15, %s568_s16  }
   0xb   :  { %s569_s20 = smov [#allocation2]   ;;  %s570_s3 = smov [#allocation7]  }
   0xc   :  { %s22_s21 = sshll.u32 %s569_s20, 4  ;;  %s48_s22 = sshll.u32 %s570_s3, 4  ;;  %s23_s21 = int_to_ptr.vmem [resolvable:$true] %s22_s21  ;;  %s49_s22 = int_to_ptr.vmem [resolvable:$true] %s48_s22 }
   0xd   :  { %28 = dma.hbm_to_vmem [thread:$0]  %s21_s1, 256, %s23_s21, [#allocation3], %s564_s29, %s564_s29, %s565_s30  }
   0xe   :  { %s74_s24 = sshll.u32 %s664_s5, 4  ;;  %s571_s25 = smov [#allocation10]   ;;  %s75_s24 = int_to_ptr.hbm [resolvable:$true] %s74_s24 }
   0xf   :  { %54 = dma.hbm_to_vmem [thread:$0]  %s47_s19, 1024, %s49_s22, [#allocation6], %s567_s15, %s567_s15, %s568_s16  }
  0x10   :  { %s76_s26 = sshll.u32 %s571_s25, 4  ;;  %s77_s26 = int_to_ptr.vmem [resolvable:$true] %s76_s26 }
  0x11   :  { %82 = dma.hbm_to_vmem [thread:$0]  %s75_s24, 4096, %s77_s26, [#allocation9], %s564_s29, %s564_s29, %s565_s30  }
  0x12   :  { %555 = dma.done.wait [#allocation3], 256  }
  0x13   :  { %556 = vsyncadd [#allocation3], 4294967040 }
  0x14   :  { %557 = dma.done.wait [#allocation6], 1280  }
  0x15   :  { %558 = vsyncadd [#allocation6], 4294966016 }
  0x16   :  { %559 = dma.done.wait [#allocation9], 5120  }
  0x17   :  { %560 = vsyncadd [#allocation9], 4294962176  ;;  %v123_v0 = vld [vmem:[#allocation8 + $0x30] sm:$0xff]  ;;  %v124_v1 = vld [vmem:[#allocation8 + $0x38] sm:$0xff]  ;;  %vm125_vm0 = vcmask 261120   ;;  %s369_s10 = sshll.u32 %s666_s7, 4  ;;  %s370_s10 = int_to_ptr.hbm [resolvable:$true] %s369_s10 }
  0x18   :  { %v121_v2 = vld [vmem:[#allocation8 + $0x20] sm:$0xff]  ;;  %144 = vmatpush.msra.mxu2 %v123_v0  ;;  %167 = vmatpush.msra.mxu3 %v124_v1  ;;  %v122_v3 = vld [vmem:[#allocation8 + $0x28] sm:$0xff]  ;;  %v119_v4 = vld [vmem:[#allocation8 + $0x10] sm:$0xff] }
  0x19   :  { %v120_v5 = vld [vmem:[#allocation8 + $0x18] sm:$0xff]  ;;  %v117_v6 = vld [vmem:[#allocation8] sm:$0xff]  ;;  %v118_v7 = vld [vmem:[#allocation8 + $0x8] sm:$0xff] }
  0x1a   :  { %145 = vmatpush.msra.mxu2 %v121_v2  ;;  %168 = vmatpush.msra.mxu3 %v122_v3  ;;  %v115_v8 = vld [vmem:[#allocation5] sm:$0xff]  ;;  %v114_v10 = vld [vmem:[#allocation7 + $0x38] sm:$0xff]  ;;  %v111_v13 = vld [vmem:[#allocation7 + $0x20] sm:$0xff] }
  0x1b   :  { %v113_v9 = vld [vmem:[#allocation7 + $0x30] sm:$0xff]  ;;  %v259_v11 = vld [vmem:[#allocation10 + $0x78] sm:$0xff]  ;;  %v112_v14 = vld [vmem:[#allocation7 + $0x28] sm:$0xff] }
  0x1c   :  { %146 = vmatpush.msra.mxu2 %v119_v4  ;;  %169 = vmatpush.msra.mxu3 %v120_v5  ;;  %v275_v12 = vld [vmem:[#allocation10 + $0xf8] sm:$0xff]  ;;  %v258_v15 = vld [vmem:[#allocation10 + $0x70] sm:$0xff]  ;;  %v257_v19 = vld [vmem:[#allocation10 + $0x68] sm:$0xff] }
  0x1d   :  { %v274_v16 = vld [vmem:[#allocation10 + $0xf0] sm:$0xff]  ;;  %v110_v18 = vld [vmem:[#allocation7 + $0x18] sm:$0xff]  ;;  %280 = vmatpush.msra.mxu0 %v259_v11  ;;  %303 = vmatpush.msra.mxu1 %v275_v12  ;;  %v273_v20 = vld [vmem:[#allocation10 + $0xe8] sm:$0xff] }
  0x1e   :  { %147 = vmatpush.msra.mxu2 %v117_v6  ;;  %170 = vmatpush.msra.mxu3 %v118_v7  ;;  %v109_v17 = vld [vmem:[#allocation7 + $0x10] sm:$0xff]  ;;  %v107_v21 = vld [vmem:[#allocation7] sm:$0xff]  ;;  %v108_v22 = vld [vmem:[#allocation7 + $0x8] sm:$0xff] }
  0x1f   :  { %384 = vmatmul.msk.f32.vlgmr.msra.gmra.mxu2 %vm125_vm0, %v115_v8  ;;  %386 = vmatmul.msk.f32.vlgmr.msra.gmra.mxu3 %vm125_vm0, %v115_v8  ;;  %v116_v23 = vld [vmem:[#allocation5 + $0x8] sm:$0xff]  ;;  %v256_v24 = vld [vmem:[#allocation10 + $0x60] sm:$0xff]  ;;  %v106_v27 = vld [vmem:[#allocation2 + $0x8] sm:$0xff] }
  0x20   :  { %196 = vmatpush.msrb.mxu2 %v113_v9  ;;  %219 = vmatpush.msrb.mxu3 %v114_v10  ;;  %v272_v25 = vld [vmem:[#allocation10 + $0xe0] sm:$0xff]  ;;  %v255_v28 = vld [vmem:[#allocation10 + $0x58] sm:$0xff]  ;;  %v254_v30 = vld [vmem:[#allocation10 + $0x50] sm:$0xff] }
  0x21   :  { %281 = vmatpush.msra.mxu0 %v258_v15  ;;  %304 = vmatpush.msra.mxu1 %v274_v16  ;;  %v105_v26 = vld [vmem:[#allocation2] sm:$0xff]  ;;  %v271_v29 = vld [vmem:[#allocation10 + $0xd8] sm:$0xff]  ;;  %v270_v31 = vld [vmem:[#allocation10 + $0xd0] sm:$0xff] }
  0x22   :  { %197 = vmatpush.msrb.mxu2 %v111_v13  ;;  %220 = vmatpush.msrb.mxu3 %v112_v14  ;;  %v253_v32 = vld [vmem:[#allocation10 + $0x48] sm:$0xff]  ;;  %v252_v34 = vld [vmem:[#allocation10 + $0x40] sm:$0xff]  ;;  %v251_v36 = vld [vmem:[#allocation10 + $0x38] sm:$0xff] }
  0x23   :  { %282 = vmatpush.msra.mxu0 %v257_v19  ;;  %305 = vmatpush.msra.mxu1 %v273_v20  ;;  %v269_v33 = vld [vmem:[#allocation10 + $0xc8] sm:$0xff]  ;;  %v268_v35 = vld [vmem:[#allocation10 + $0xc0] sm:$0xff]  ;;  %v267_v37 = vld [vmem:[#allocation10 + $0xb8] sm:$0xff] }
  0x24   :  { %198 = vmatpush.msrb.mxu2 %v109_v17  ;;  %221 = vmatpush.msrb.mxu3 %v110_v18  ;;  %v250_v38 = vld [vmem:[#allocation10 + $0x30] sm:$0xff]  ;;  %v249_v40 = vld [vmem:[#allocation10 + $0x28] sm:$0xff]  ;;  %v248_v42 = vld [vmem:[#allocation10 + $0x20] sm:$0xff] }
  0x25   :  { %283 = vmatpush.msra.mxu0 %v256_v24  ;;  %306 = vmatpush.msra.mxu1 %v272_v25  ;;  %v266_v39 = vld [vmem:[#allocation10 + $0xb0] sm:$0xff]  ;;  %v265_v41 = vld [vmem:[#allocation10 + $0xa8] sm:$0xff]  ;;  %v264_v43 = vld [vmem:[#allocation10 + $0xa0] sm:$0xff] }
  0x26   :  { %199 = vmatpush.msrb.mxu2 %v107_v21  ;;  %222 = vmatpush.msrb.mxu3 %v108_v22  ;;  %v247_v44 = vld [vmem:[#allocation10 + $0x18] sm:$0xff]  ;;  %v246_v46 = vld [vmem:[#allocation10 + $0x10] sm:$0xff]  ;;  %v245_v48 = vld [vmem:[#allocation10 + $0x8] sm:$0xff] }
  0x27   :  { %385 = vmatmul.msk.f32.gmra.mxu2 %vm125_vm0, %v116_v23  ;;  %387 = vmatmul.msk.f32.gmra.mxu3 %vm125_vm0, %v116_v23  ;;  %v263_v45 = vld [vmem:[#allocation10 + $0x98] sm:$0xff]  ;;  %v262_v47 = vld [vmem:[#allocation10 + $0x90] sm:$0xff]  ;;  %v261_v49 = vld [vmem:[#allocation10 + $0x88] sm:$0xff] }
  0x28   :  { %284 = vmatpush.msra.mxu0 %v255_v28  ;;  %307 = vmatpush.msra.mxu1 %v271_v29  ;;  %v244_v50 = vld [vmem:[#allocation10] sm:$0xff] }
  0x29   :  { %v260_v51 = vld [vmem:[#allocation10 + $0x80] sm:$0xff] }
  0x2a   :  { %285 = vmatpush.msra.mxu0 %v254_v30  ;;  %308 = vmatpush.msra.mxu1 %v270_v31  ;;  %v230_v56 = vld [vmem:[%s663_s4] sm:$0x3] }
  0x2b   :  { %v232_v57 = vperm.slane %v230_v56, 0  ;;  %v233_v58 = vperm.slane %v230_v56, 1  ;;  %v402_v11 = vld [vmem:[%s665_s6] ss:$0 sm:$0xff]  ;;  %s572_s6 = smov [#allocation11]  }
  0x2c   :  { %286 = vmatpush.msra.mxu0 %v253_v32  ;;  %309 = vmatpush.msra.mxu1 %v269_v33  ;;  %s367_s28 = sshll.u32 %s572_s6, 4  ;;  %s368_s28 = int_to_ptr.vmem [resolvable:$true] %s367_s28 }
  0x2e   :  { %287 = vmatpush.msra.mxu0 %v252_v34  ;;  %310 = vmatpush.msra.mxu1 %v268_v35 }
  0x2f   :  { %388 = vmatmul.msk.f32.vlgmr.msrb.gmra.mxu2 %vm125_vm0, %v105_v26  ;;  %390 = vmatmul.msk.f32.vlgmr.msrb.gmra.mxu3 %vm125_vm0, %v105_v26 }
  0x30   :  { %288 = vmatpush.msra.mxu0 %v251_v36  ;;  %311 = vmatpush.msra.mxu1 %v267_v37 }
  0x32   :  { %289 = vmatpush.msra.mxu0 %v250_v38  ;;  %312 = vmatpush.msra.mxu1 %v266_v39 }
  0x34   :  { %290 = vmatpush.msra.mxu0 %v249_v40  ;;  %313 = vmatpush.msra.mxu1 %v265_v41 }
  0x36   :  { %291 = vmatpush.msra.mxu0 %v248_v42  ;;  %314 = vmatpush.msra.mxu1 %v264_v43 }
  0x37   :  { %389 = vmatmul.msk.f32.gmra.mxu2 %vm125_vm0, %v106_v27  ;;  %391 = vmatmul.msk.f32.gmra.mxu3 %vm125_vm0, %v106_v27  ;;  %v354_v27 = vlaneseq }
  0x38   :  { %292 = vmatpush.msra.mxu0 %v247_v44  ;;  %315 = vmatpush.msra.mxu1 %v263_v45 }
  0x39   :  { %v355_v33 = vand.u32 127, %v354_v27 }
  0x3a   :  { %293 = vmatpush.msra.mxu0 %v246_v46  ;;  %316 = vmatpush.msra.mxu1 %v262_v47 }
  0x3b   :  { %vm356_vm3 = vcmp.lt.s32.totalorder %v355_v33, 8 }
  0x3c   :  { %294 = vmatpush.msra.mxu0 %v245_v48  ;;  %317 = vmatpush.msra.mxu1 %v261_v49 }
  0x3e   :  { %295 = vmatpush.msra.mxu0 %v244_v50  ;;  %318 = vmatpush.msra.mxu1 %v260_v51 }
  0xa2   :  { %v149_v52 = vpop.f32.mrf.mxu2  ;;  %v172_v53 = vpop.f32.mrf.mxu3 }
  0xaa   :  { %v152_v54 = vpop.f32.mrf.mxu2  ;;  %v175_v55 = vpop.f32.mrf.mxu3 }
  0xb2   :  { %v201_v59 = vpop.f32.mrf.mxu2  ;;  %v224_v60 = vpop.f32.mrf.mxu3 }
  0xb3   :  { %v202_v61 = vadd.f32 %v201_v59, %v149_v52  ;;  %v225_v62 = vadd.f32 %v224_v60, %v172_v53 }
  0xb5   :  { %v236_v63 = vadd.f32 %v232_v57, %v202_v61  ;;  %v237_v0 = vadd.f32 %v233_v58, %v225_v62 }
  0xb7   :  { %v240_v1 = vmax.f32 %v236_v63, 0.0  ;;  %v241_v2 = vmax.f32 %v237_v0, 0.0 }
  0xb9   :  { %296 = vmatmul.f32.vlgmr.msra.gmra.mxu0 %v240_v1  ;;  %319 = vmatmul.f32.vlgmr.msra.gmra.mxu1 %v241_v2 }
  0xba   :  { %v204_v3 = vpop.f32.mrf.mxu2  ;;  %v227_v4 = vpop.f32.mrf.mxu3 }
  0xbb   :  { %v205_v5 = vadd.f32 %v204_v3, %v152_v54  ;;  %v228_v6 = vadd.f32 %v227_v4, %v175_v55 }
  0xbd   :  { %v238_v7 = vadd.f32 %v232_v57, %v205_v5  ;;  %v239_v8 = vadd.f32 %v233_v58, %v228_v6 }
  0xbf   :  { %v242_v9 = vmax.f32 %v238_v7, 0.0  ;;  %v243_v10 = vmax.f32 %v239_v8, 0.0 }
  0xc1   :  { %299 = vmatmul.f32.gmra.mxu0 %v242_v9  ;;  %322 = vmatmul.f32.gmra.mxu1 %v243_v10 }
 0x136   :  { %v297_v12 = vpop.f32.mrf.mxu0  ;;  %v320_v13 = vpop.f32.mrf.mxu1 }
 0x137   :  { %v298_v14 = vadd.f32 %v402_v11, %v297_v12 }
 0x139   :  { %v321_v15 = vadd.f32 %v320_v13, %v298_v14 }
 0x13b   :  { %v328_v16 = vmin.f32 %v321_v15, 20.0  ;;  %vm326_vm2 = vcmp.gt.f32.partialorder %v321_v15, 20.0 }
 0x13d   :  { %v330_v17 = vmul.f32 1.442695, %v328_v16 }
 0x13e   :  { %v300_v18 = vpop.f32.mrf.mxu0  ;;  %v323_v20 = vpop.f32.mrf.mxu1 }
 0x13f   :  { %403 = vpow2.f32 %v330_v17  ;;  %v301_v19 = vadd.f32 %v402_v11, %v300_v18 }
 0x141   :  { %v324_v21 = vadd.f32 %v323_v20, %v301_v19 }
 0x143   :  { %v329_v22 = vmin.f32 %v324_v21, 20.0  ;;  %vm327_vm5 = vcmp.gt.f32.partialorder %v324_v21, 20.0 }
 0x145   :  { %v404_v23 = vpop.eup %403  ;;  %v332_v24 = vmul.f32 1.442695, %v329_v22 }
 0x146   :  { %v334_v25 = vadd.f32 1.0, %v404_v23  ;;  %v337_v26 = vmul.f32 -0.5, %v404_v23  ;;  %v340_v29 = vand.u32 2147483647, %v404_v23 }
 0x147   :  { %405 = vpow2.f32 %v332_v24 }
 0x148   :  { %407 = vlog2.f32 %v334_v25  ;;  %v338_v28 = vadd.f32 1.0, %v337_v26  ;;  %vm341_vm1 = vcmp.lt.f32.partialorder %v340_v29, 0.0004427343 }
 0x14a   :  { %v339_v35 = vmul.f32 %v404_v23, %v338_v28 }
 0x14d   :  { %v406_v30 = vpop.eup %405 }
 0x14e   :  { %v408_v31 = vpop.eup %407  ;;  %v343_v32 = vadd.f32 1.0, %v406_v30  ;;  %v346_v36 = vmul.f32 -0.5, %v406_v30  ;;  %v349_v41 = vand.u32 2147483647, %v406_v30 }
 0x14f   :  { %v336_v34 = vmul.f32 0.6931472, %v408_v31 }
 0x150   :  { %409 = vlog2.f32 %v343_v32  ;;  %v347_v40 = vadd.f32 1.0, %v346_v36  ;;  %vm350_vm4 = vcmp.lt.f32.partialorder %v349_v41, 0.0004427343 }
 0x151   :  { %v342_v37 = vsel %vm341_vm1, %v339_v35, %v336_v34 }
 0x152   :  { %v352_v38 = vsel %vm326_vm2, %v321_v15, %v342_v37  ;;  %v348_v45 = vmul.f32 %v406_v30, %v347_v40 }
 0x153   :  { %v357_v39 = vadd.f32 1.0, %v352_v38 }
 0x155   :  { %v359_v42 = vsel %vm356_vm3, %v357_v39, %v321_v15 }
 0x156   :  { %v410_v43 = vpop.eup %409  ;;  %361 = vst [vmem:[#allocation11] sm:$0xff] %v359_v42 }
 0x157   :  { %v345_v44 = vmul.f32 0.6931472, %v410_v43 }
 0x159   :  { %v351_v46 = vsel %vm350_vm4, %v348_v45, %v345_v44 }
 0x15a   :  { %v353_v47 = vsel %vm327_vm5, %v324_v21, %v351_v46 }
 0x15b   :  { %v358_v48 = vadd.f32 1.0, %v353_v47 }
 0x15d   :  { %v360_v49 = vsel %vm356_vm3, %v358_v48, %v324_v21 }
 0x15e   :  { %362 = vst [vmem:[#allocation11 + $0x8] sm:$0xff] %v360_v49 }
 0x15f   :  { %375 = dma.vmem_to_hbm [thread:$0]  %s368_s28, 256, %s370_s10, [#allocation4], %s564_s29, %s564_s29, %s565_s30  }
 0x160   :  { %561 = dma.done.wait [#allocation4], 256  }
 0x161   :  { %562 = vsyncadd [#allocation4], 4294967040 }
 0x162   :  { %380 = vsyncpa [#allocation3], 1 }
 0x163   :  { %381 = vsyncpa [#allocation6], 1 }
 0x164   :  { %382 = vsyncpa [#allocation9], 1 }
 0x165   :  { %383 = vsyncpa [#allocation4], 1 }

</bundles_post_ra>
